<compile_context>
chip_gen: v7x
topology: tpu7x:2x2x1
jax: 0.10.0
libtpu: 0.0.40
codegen_flags: <defaults>
</compile_context>

<pallas_src>
import functools

import jax
import jax.numpy as jnp
import numpy as np
from jax.experimental import pallas as pl
from jax.experimental.pallas import tpu as pltpu


# ----------------------------------------------------------------------------
# Generation-aware VMEM sizing
# ----------------------------------------------------------------------------
@functools.lru_cache(maxsize=None)
def _vmem_capacity_bytes():
    try:
        cap = getattr(pltpu.get_tpu_info(), "vmem_capacity_bytes", None)
        if cap:
            return int(cap)
    except Exception:
        pass
    return 64 * 1024 * 1024  # conservative default (v7x-sized VMEM)


@functools.lru_cache(maxsize=None)
def _mm_vmem_params():
    """(double-buffered bf16 A/B tile budget, vmem_limit clamp) per TPU generation."""
    cap = _vmem_capacity_bytes()
    if cap >= 100 * 1024 * 1024:                     # v5e / v6e: 128 MiB VMEM per core
        return 40 * 1024 * 1024, 96 * 1024 * 1024
    return 12 * 1024 * 1024, 48 * 1024 * 1024        # v7x: 64 MiB VMEM per core


_POOL_VMEM_BUDGET = 8 * 1024 * 1024


# ----------------------------------------------------------------------------
# Pallas kernels
# ----------------------------------------------------------------------------
def _matmul_kernel_multi_k(a_ref, b_ref, bias_ref, o_ref, acc_ref, *, relu):
    """Tiled matmul with f32 accumulator across the K grid axis; fused bias (+ReLU)."""
    @pl.when(pl.program_id(2) == 0)
    def _init():
        acc_ref[...] = jnp.zeros_like(acc_ref)

    acc_ref[...] += jnp.dot(a_ref[...], b_ref[...],
                            preferred_element_type=jnp.float32)

    @pl.when(pl.program_id(2) == pl.num_programs(2) - 1)
    def _finish():
        r = acc_ref[...] + bias_ref[...]
        if relu:
            r = jnp.maximum(r, 0.0)
        o_ref[...] = r.astype(o_ref.dtype)


def _matmul_kernel_single_k(a_ref, b_ref, bias_ref, o_ref, *, relu):
    """Single-K-step matmul: no accumulator scratch, no pl.when branches."""
    r = jnp.dot(a_ref[...], b_ref[...],
                preferred_element_type=jnp.float32) + bias_ref[...]
    if relu:
        r = jnp.maximum(r, 0.0)
    o_ref[...] = r.astype(o_ref.dtype)


def _maxpool_kernel(x_ref, o_ref, *, c):
    """2x2/stride-2 max pool. x block: (tr, 2, Wo, 2*C); out block: (tr, Wo, C)."""
    r = jnp.maximum(x_ref[:, 0, :, :], x_ref[:, 1, :, :])   # max over the 2 pooled rows
    o_ref[...] = jnp.maximum(r[:, :, :c], r[:, :, c:])      # max over the 2 pooled cols


# ----------------------------------------------------------------------------
# Pallas wrappers
# ----------------------------------------------------------------------------
def _round_up(x, m):
    return ((x + m - 1) // m) * m


def _largest_divisor_tile(dim, candidates):
    for c in candidates:
        if dim % c == 0:
            return c
    return 128


def pallas_matmul(a, b, bias=None, relu=False, out_dtype=jnp.float32, n_valid=None):
    """out = relu?(a @ b + bias)[:M, :n_valid].

    a: (M, K).  b: (Kb, Nb) with Kb >= K — b and bias may be pre-padded once (at init)
    to 128-aligned shapes so no per-forward weight copies happen here.
    Operands are cast to bf16; accumulation is f32 on the MXU.
    """
    M, K = a.shape
    Kb, Nb = b.shape
    assert Kb >= K
    if n_valid is None:
        n_valid = Nb

    a = a.astype(jnp.bfloat16)
    b = b.astype(jnp.bfloat16)

    Kp, Np = _round_up(Kb, 128), _round_up(Nb, 128)
    if (Kp, Np) != (Kb, Nb):                       # only hit if b was NOT pre-padded
        b = jnp.pad(b, ((0, Kp - Kb), (0, Np - Nb)))
    if bias is None:
        bias = jnp.zeros((Np,), jnp.float32)
    else:
        bias = bias.astype(jnp.float32)
        if bias.shape[0] != Np:
            bias = jnp.pad(bias, (0, Np - bias.shape[0]))
    bias = bias.reshape(1, Np)

    # Pad M only to the 16-row bf16 sublane pack (NOT 128): the FC layers run at batch=2
    # and padding them to 128 rows wasted ~25% extra HBM traffic on FC1.
    Mp = _round_up(M, 16)
    if (Mp, Kp) != (M, K):
        a = jnp.pad(a, ((0, Mp - M), (0, Kp - K)))

    tm = _largest_divisor_tile(Mp, (512, 256, 128, 64, 32, 16))
    tn = _largest_divisor_tile(Np, (512, 256, 128))
    # Keep at least 2 blocks on a "parallel" grid axis when possible so both v7x
    # TensorCores get work (near-zero cost on the 1-TC v5e/v6e parts).
    if Mp // tm == 1 and Np // tn < 2:
        if Np >= 256:
            multi = [c for c in (512, 256, 128) if Np % c == 0 and Np // c >= 2]
            if multi:
                tn = max(multi)
        elif Mp >= 32:
            multi = [c for c in (512, 256, 128, 64, 32, 16)
                     if Mp % c == 0 and Mp // c >= 2]
            if multi:
                tm = max(multi)

    budget, clamp = _mm_vmem_params()
    # Largest 128-multiple dividing Kp whose double-buffered bf16 A/B tiles fit the
    # generation-aware budget (bigger tiles => fewer ~0.35us grid steps on the HBM-bound FC1).
    tk_cap = min(Kp, max(128, budget // (4 * (tm + tn))))
    tk = 128
    for mult in range(Kp // 128, 0, -1):
        cand = 128 * mult
        if cand <= tk_cap and Kp % cand == 0:
            tk = cand
            break
    k_steps = Kp // tk

    out_itemsize = np.dtype(out_dtype).itemsize
    work_set = (2 * (tm * tk + tk * tn) * 2        # double-buffered bf16 A/B tiles
                + 2 * tm * tn * out_itemsize       # double-buffered output tile
                + tm * tn * 4                      # f32 accumulator
                + 2 * Np * 4)                      # bias
    vmem_limit = int(min(max(work_set + work_set // 2, 32 * 1024 * 1024), clamp))

    if k_steps == 1:
        out = pl.pallas_call(
            functools.partial(_matmul_kernel_single_k, relu=relu),
            out_shape=jax.ShapeDtypeStruct((Mp, Np), out_dtype),
            grid_spec=pltpu.PrefetchScalarGridSpec(
                num_scalar_prefetch=0,
                grid=(Mp // tm, Np // tn),
                in_specs=[
                    pl.BlockSpec((tm, tk), lambda i, j: (i, 0)),
                    pl.BlockSpec((tk, tn), lambda i, j: (0, j)),
                    pl.BlockSpec((1, tn), lambda i, j: (0, j)),
                ],
                out_specs=pl.BlockSpec((tm, tn), lambda i, j: (i, j)),
            ),
            compiler_params=pltpu.CompilerParams(
                dimension_semantics=("parallel", "parallel"),
                vmem_limit_bytes=vmem_limit),
        )(a, b, bias)
    else:
        out = pl.pallas_call(
            functools.partial(_matmul_kernel_multi_k, relu=relu),
            out_shape=jax.ShapeDtypeStruct((Mp, Np), out_dtype),
            grid_spec=pltpu.PrefetchScalarGridSpec(
                num_scalar_prefetch=0,
                grid=(Mp // tm, Np // tn, k_steps),
                in_specs=[
                    pl.BlockSpec((tm, tk), lambda i, j, k: (i, k)),
                    pl.BlockSpec((tk, tn), lambda i, j, k: (k, j)),
                    pl.BlockSpec((1, tn), lambda i, j, k: (0, j)),
                ],
                out_specs=pl.BlockSpec((tm, tn), lambda i, j, k: (i, j)),
                scratch_shapes=[pltpu.VMEM((tm, tn), jnp.float32)],
            ),
            compiler_params=pltpu.CompilerParams(
                dimension_semantics=("parallel", "parallel", "arbitrary"),
                vmem_limit_bytes=vmem_limit),
        )(a, b, bias)

    if (Mp, Np) != (M, n_valid):
        out = out[:M, :n_valid]
    return out


def pallas_maxpool2x2(x):
    """2x2 / stride-2 max pool on NHWC input; single read, lane-dense Pallas path."""
    N, H, W, C = x.shape
    Ho, Wo = H // 2, W // 2
    if H % 2 or W % 2:
        x = x[:, :Ho * 2, :Wo * 2, :]

    if C % 128 != 0:
        # TODO(synk): first VGG pool has C=64 (< one lane register); the lane-dense Pallas
        # path needs 128-aligned channels, so use a fused XLA reduction here (still a single
        # pass over the tensor, no strided tap copies).
        return x.reshape(N, Ho, 2, Wo, 2, C).max(axis=(2, 4))

    R = N * Ho
    xr = x.reshape(R, 2, Wo, 2 * C)            # contiguous reshape (free)

    itemsize = np.dtype(x.dtype).itemsize
    per_row = (2 * Wo * 2 * C + Wo * C) * itemsize * 2   # double-buffered in + out per row
    cap = max(8, _POOL_VMEM_BUDGET // per_row)
    tr = R
    for cand in (256, 128, 64, 32, 16, 8):
        if cand <= cap and R % cand == 0:
            tr = cand
            break

    out = pl.pallas_call(
        functools.partial(_maxpool_kernel, c=C),
        out_shape=jax.ShapeDtypeStruct((R, Wo, C), x.dtype),
        grid_spec=pltpu.PrefetchScalarGridSpec(
            num_scalar_prefetch=0,
            grid=(R // tr,),
            in_specs=[pl.BlockSpec((tr, 2, Wo, 2 * C), lambda i: (i, 0, 0, 0))],
            out_specs=pl.BlockSpec((tr, Wo, C), lambda i: (i, 0, 0)),
        ),
        compiler_params=pltpu.CompilerParams(
            dimension_semantics=("parallel",)),
    )(xr)
    return out.reshape(N, Ho, Wo, C)


def conv3x3_relu(x, w_mat, b, cout):
    """3x3 / pad-1 conv + ReLU via im2col + fused Pallas matmul.
    x: NHWC bf16, w_mat: (Kp, Np) bf16 pre-packed/padded in (kh, kw, cin) x cout order."""
    N, H, W, Cin = x.shape
    xp = jnp.pad(x, ((0, 0), (1, 1), (1, 1), (0, 0)))
    # TODO(synk): the 9 taps are still materialized by XLA (im2col, bf16 so half traffic);
    # fusing the tap gather into the matmul K grid needs element-offset BlockSpecs / manual DMA.
    cols = jnp.concatenate(
        [xp[:, dh:dh + H, dw:dw + W, :] for dh in range(3) for dw in range(3)],
        axis=-1)
    A = cols.reshape(N * H * W, 9 * Cin)
    out = pallas_matmul(A, w_mat, bias=b, relu=True,
                        out_dtype=jnp.bfloat16, n_valid=cout)
    return out.reshape(N, H, W, cout)


def _adaptive_pool_matrix(in_size, out_size):
    m = np.zeros((out_size, in_size), np.float32)
    for i in range(out_size):
        start = (i * in_size) // out_size
        end = -((-(i + 1) * in_size) // out_size)  # ceil
        m[i, start:end] = 1.0 / (end - start)
    return jnp.asarray(m)


# ----------------------------------------------------------------------------
# Model: parameters + forward
# ----------------------------------------------------------------------------
_VGG16_CFG = [64, 64, 'M', 128, 128, 'M', 256, 256, 256, 'M',
              512, 512, 512, 'M', 512, 512, 512, 'M']


def init_params(key):
    conv_params = []
    cin = 3
    for v in _VGG16_CFG:
        if v == 'M':
            continue
        key, k1 = jax.random.split(key)
        fan_in = 9 * cin
        w = jax.random.normal(k1, (3, 3, cin, v), jnp.float32) * jnp.sqrt(2.0 / fan_in)
        # Pre-packed (kh, kw, cin) x cout matmul operand, padded ONCE to 128-aligned
        # K/N (so no per-forward weight/bias pads), stored in bf16.
        kp, npad = _round_up(9 * cin, 128), _round_up(v, 128)
        w_mat = jnp.pad(w.reshape(9 * cin, v), ((0, kp - 9 * cin), (0, npad - v)))
        conv_params.append((w_mat.astype(jnp.bfloat16),
                            jnp.zeros((npad,), jnp.float32), v))
        cin = v
    key, k1, k2 = jax.random.split(key, 3)
    # FC weights stored pre-transposed as (in_features, out_features).
    w1 = (jax.random.normal(k1, (25088, 4096), jnp.float32)
          * jnp.sqrt(2.0 / 25088)).astype(jnp.bfloat16)
    b1 = jnp.zeros((4096,), jnp.float32)
    w2 = jax.random.normal(k2, (4096, 1), jnp.float32) * jnp.sqrt(2.0 / 4096)
    b2 = jnp.zeros((1,), jnp.float32)
    return conv_params, (w1, b1, w2, b2)


def simple_model_plus_forward(x_nchw, conv_params, fc_params):
    # NCHW (PyTorch convention) -> NHWC bf16 for the conv stack.
    x = jnp.transpose(x_nchw, (0, 2, 3, 1)).astype(jnp.bfloat16)

    ci = 0
    for v in _VGG16_CFG:
        if v == 'M':
            x = pallas_maxpool2x2(x)
        else:
            w_mat, b, cout = conv_params[ci]
            ci += 1
            x = conv3x3_relu(x, w_mat, b, cout)

    # AdaptiveAvgPool2d((7, 7)), then flatten in torch's (c, h, w) order.
    N, Hf, Wf, C = x.shape
    if (Hf, Wf) == (7, 7):
        flat = jnp.transpose(x, (0, 3, 1, 2)).reshape(N, C * 49)
    else:
        # Small pooling reduction: a 128-padded MXU matmul would be mostly zeros, so keep
        # it in XLA with the 1/k pooling weights in f32 (consistent rounding on every path).
        mh = _adaptive_pool_matrix(Hf, 7)
        mw = _adaptive_pool_matrix(Wf, 7)
        k_hw = jnp.kron(mh, mw)                                    # (49, Hf*Wf)
        x_flat = jnp.transpose(x, (0, 3, 1, 2)).reshape(N * C, Hf * Wf)
        pooled = jnp.einsum('pi,oi->po', x_flat.astype(jnp.float32), k_hw)
        flat = pooled.reshape(N, C * 49)                           # (N, 25088)

    w1, b1, w2, b2 = fc_params
    h = pallas_matmul(flat, w1, bias=b1, relu=True,
                      out_dtype=jnp.bfloat16)                      # Linear(25088->4096)+ReLU
    # TODO(synk): Dropout(p=0.5) is identity in eval mode; training-mode stochastic mask not implemented.
    # FC2 is a (batch x 4096) @ (4096 x 1) GEMV: a 128-padded MXU kernel would do ~8000x the
    # useful work, so it stays a plain f32 XLA dot.
    out = jnp.dot(h.astype(jnp.float32), w2) + b2                  # Linear(4096->1)
    return out


# ----------------------------------------------------------------------------
# Demo
# ----------------------------------------------------------------------------
if __name__ == "__main__":
    key = jax.random.PRNGKey(0)
    k_params, k_x = jax.random.split(key)

    conv_params, fc_params = init_params(k_params)

    # 32x32 input: the 5 VGG max-pools take it to 1x1x512; AdaptiveAvgPool2d((7,7)) then
    # broadcasts to 7x7 exactly as torch does.
    x = jax.random.normal(k_x, (2, 3, 32, 32), jnp.float32)

    out = simple_model_plus_forward(x, conv_params, fc_params)
    out = jax.block_until_ready(out)

    assert out.shape == (2, 1), out.shape
    assert out.dtype == jnp.float32
    print("KERNEL_OK")
</pallas_src>

<mosaic_0001>
module attributes {stable_mosaic.version = 11 : i64} {
  func.func @_matmul_kernel_single_k(%arg0: i32, %arg1: i32, %arg2: memref<512x128xbf16, #tpu.memory_space<vmem>>, %arg3: memref<128x128xbf16, #tpu.memory_space<vmem>>, %arg4: memref<1x128xf32, #tpu.memory_space<vmem>>, %arg5: memref<512x128xbf16, #tpu.memory_space<vmem>>) attributes {dimension_semantics = [#tpu.dimension_semantics<parallel>, #tpu.dimension_semantics<parallel>], iteration_bounds = array<i64: 4, 1>, scalar_prefetch = 0 : i64, scratch_operands = 0 : i64, tpu.core_type = #tpu.core_type<tc>, window_params = [{transform_indices = @transform_0, window_bounds = array<i64: 512, 128>}, {transform_indices = @transform_1, window_bounds = array<i64: 128, 128>}, {transform_indices = @transform_2, window_bounds = array<i64: 1, 128>}, {transform_indices = @transform_3, window_bounds = array<i64: 512, 128>}]} {
    %c0 = arith.constant 0 : index
    %c0_0 = arith.constant 0 : index
    %0 = vector.load %arg2[%c0, %c0_0] : memref<512x128xbf16, #tpu.memory_space<vmem>>, vector<512x128xbf16>
    %c0_1 = arith.constant 0 : index
    %c0_2 = arith.constant 0 : index
    %1 = vector.load %arg3[%c0_1, %c0_2] : memref<128x128xbf16, #tpu.memory_space<vmem>>, vector<128x128xbf16>
    %cst = arith.constant dense<0.000000e+00> : vector<512x128xf32>
    %2 = tpu.matmul %0, %1, %cst {dimension_numbers = #tpu.dot_dimension_numbers<[1], [0], [0], [1], [0, 0, 1, 1], [], []>} : vector<512x128xbf16>, vector<128x128xbf16>, vector<512x128xf32> -> vector<512x128xf32>
    %c0_3 = arith.constant 0 : index
    %c0_4 = arith.constant 0 : index
    %3 = vector.load %arg4[%c0_3, %c0_4] : memref<1x128xf32, #tpu.memory_space<vmem>>, vector<1x128xf32>
    %4 = vector.broadcast %3 : vector<1x128xf32> to vector<512x128xf32>
    %5 = arith.addf %2, %4 : vector<512x128xf32>
    %cst_5 = arith.constant 0.000000e+00 : f32
    %6 = vector.broadcast %cst_5 : f32 to vector<512x128xf32>
    %7 = arith.maximumf %5, %6 : vector<512x128xf32>
    %8 = arith.truncf %7 : vector<512x128xf32> to vector<512x128xbf16>
    %c0_6 = arith.constant 0 : index
    %c0_7 = arith.constant 0 : index
    %9 = vector.load %arg5[%c0_6, %c0_7] : memref<512x128xbf16, #tpu.memory_space<vmem>>, vector<512x128xbf16>
    tpu.vector_store %arg5[%c0_6, %c0_7], %8 {strides = array<i32>} : memref<512x128xbf16, #tpu.memory_space<vmem>>, vector<512x128xbf16>,
    return
  }
  func.func @transform_0(%arg0: i32, %arg1: i32) -> (i32, i32) {
    %c0_i32 = arith.constant 0 : i32
    %c0_i32_0 = arith.constant 0 : i32
    return %arg0, %c0_i32 : i32, i32
  }
  func.func @transform_1(%arg0: i32, %arg1: i32) -> (i32, i32) {
    %c0_i32 = arith.constant 0 : i32
    %c0_i32_0 = arith.constant 0 : i32
    return %c0_i32, %arg1 : i32, i32
  }
  func.func @transform_2(%arg0: i32, %arg1: i32) -> (i32, i32) {
    %c0_i32 = arith.constant 0 : i32
    %c0_i32_0 = arith.constant 0 : i32
    return %c0_i32, %arg1 : i32, i32
  }
  func.func @transform_3(%arg0: i32, %arg1: i32) -> (i32, i32) {
    %c0_i32 = arith.constant 0 : i32
    return %arg0, %arg1 : i32, i32
  }
}

</mosaic_0001>

<bundles_post_ra>
// kernel: tpu_custom_call.1
= control target key start
LH: loop header
LB: loop body
LE: loop exit
PB: predicated region body
PF: predicated region fallthrough
CT: control target
= control target key end

     0   :  { %8 = vsyncpa [#allocation3], 0  ;;  %s2535_s0 = inlined_call_operand.hbm [shape: bf16[2048,128], index: 0, kind: input, shape index: {}]   ;;  %s2536_s1 = inlined_call_operand.hbm [shape: bf16[128,128], index: 1, kind: input, shape index: {}]   ;;  %s2537_s2 = inlined_call_operand.vmem [shape: f32[1,128], index: 2, kind: input, shape index: {}]   ;;  %s2538_s3 = inlined_call_operand.hbm [shape: bf16[2048,128], index: 3, kind: output, shape index: {}]  }
   0x1   :  { %10 = vsyncpa [#allocation3 + $0x1], 0 }
   0x2   :  { %11 = vsyncpa [#allocation6], 0 }
   0x3   :  { %12 = vsyncpa [#allocation4], 0 }
   0x4   :  { %14 = vsyncpa [#allocation4 + $0x1], 0  ;;  %s2170_s12 = smov 0   ;;  %s2172_s13 = smov 0  }
   0x5   :  { %s2174_s14 = smov 0   ;;  %s2176_s15 = smov 0  }
   0x6   :  { %s2178_s16 = smov 0   ;;  %s2180_s17 = smov 0  }
   0x7 LB: > { %s1364_s18 = sadd.s32 4294967295, %s2141_s17   ;;  %s1365_s19 = sadd.s32 4294967294, %s2141_s17   ;;  %s2141_s17 = sphi %s2180_s17, %s20_s17   ;;  %s2137_s16 = sphi %s2178_s16, %s2561_s16   ;;  %s2133_s15 = sphi %s2176_s15, %s2560_s15   ;;  %s2129_s14 = sphi %s2174_s14, %s2559_s14   ;;  %s2125_s13 = sphi %s2172_s13, %s2558_s13   ;;  %s2121_s12 = sphi %s2170_s12, %s2557_s12  }
   0x8   : > { %p52_p0 = scmp.ne.s32.totalorder %s2125_s13, %s2121_s12  ;;  %p2204_p1 = scmp.eq.s32.totalorder %s1364_s18, 0 }
   0x9   : > { %p2208_p2 = scmp.eq.s32.totalorder %s1364_s18, 3  ;;  %p136_p3 = scmp.eq.s32.totalorder %s1365_s19, 3 }
   0xa   : > { %s2543_s20 = scalar_select %p2204_p1, 1, 0 }
   0xb   : > { %s2544_s21 = scalar_select %p2208_p2, 1, 0 }
   0xc   : > { %p2214_p4 = por %p2204_p1, %p52_p0  ;;  %p1366_p5 = scmp.ge.s32.totalorder %s2141_s17, 1 }
   0xd   : > { %p2219_p6 = por %p136_p3, %p52_p0  ;;  %p143_p7 = scmp.lt.s32.totalorder %s2141_s17, 5 }
   0xe   : > { %s2545_s22 = scalar_select %p2214_p4, 1, 0 }
   0xf   : > { %s2546_s23 = scalar_select %p2219_p6, 1, 0 }
  0x10   : > { %p2224_p8 = pnand %p1366_p5, %p143_p7  ;;  %s2143_s25 = smov [#allocation5]  }
  0x11   : > { %s157_s26 = sshll.u32 %s2143_s25, 4  ;;  %s32_s28 = sadd.s32 1, %s2137_s16  ;;  %s158_s26 = int_to_ptr.vmem [resolvable:$true] %s157_s26 }
  0x12   : > { %s2547_s24 = scalar_select %p2224_p8, 1, 0 }
  0x13   : > { %p1888_p9 = pneg %p2224_p8  ;;  %s1997_s4 = scalar_lea.hbm %s2536_s1, 1024 }
  0x14   : > { %p1998_p11 = scmp.ne.s32.totalorder %s2536_s1, %s1997_s4  ;;  %p2004_p3 = scmp.lt.u32.totalorder %s1997_s4, %s2536_s1 }
  0x15   : > { %p2232_p10 = pnand %p1888_p9, %p2204_p1 }
  0x17   : > { %p1999_p12 = pneg %p2232_p10 }
  0x19   : > { %p2000_p13 = pnand %p1999_p12, %p1998_p11 }
  0x1b   : > { %p2001_p0 = pneg %p2000_p13 }
  0x1d   : > { %p2006_p5 = pnand %p2004_p3, %p2001_p0 }
  0x1f   : > { %2009 = shalt.err (!%p2006_p5)
}
  0x20   : > { %s2010_s9 = scalar_lea.vmem %s158_s26, 1024  ;;  %p2018_p1 = scmp.lt.s32.totalorder %s158_s26, %s158_s26 }
  0x21   : > { %p2011_p7 = scmp.ne.s32.totalorder %s158_s26, %s2010_s9  ;;  %p2019_p4 = scmp.lt.s32.totalorder %s2010_s9, %s2010_s9 }
  0x23   : > { %p2013_p9 = pnand %p2011_p7, %p1999_p12  ;;  %p2020_p8 = por %p2019_p4, %p2018_p1 }
  0x25   : > { %p2014_p6 = pneg %p2013_p9 }
  0x27   : > { %p2021_p2 = pnand %p2020_p8, %p2014_p6 }
  0x29   : > { %2024 = shalt.err (!%p2021_p2)
}
  0x2a   : > { %s2144_s10 = smov 64   ;;  %s2145_s11 = smov 4  }
  0x2b   : > { %1891 = dma.hbm_to_vmem [thread:$0]  (!%p2232_p10), %s2536_s1, 1024, %s158_s26, [#allocation6], %s2144_s10, %s2144_s10, %s2145_s11  }
  0x2c   : > { %p34_p1 = scmp.ge.s32.totalorder %s32_s28, 4  ;;  %s39_s25 = sadd.s32 1, %s2129_s14 }
  0x2d   : > { %p46_p2 = scmp.ne.s32.totalorder %s2129_s14, %s2125_s13  ;;  %p47_p4 = scmp.eq.s32.totalorder %s2141_s17, 0 }
  0x2e   : > { %s2563_s28 = smov (%p34_p1, %s32_s28), 0  ;;  %p2550_p8 = scmp.ne.s32.totalorder %s2544_s21, 0 }
  0x2f   : > { %p2262_p6 = por %p47_p4, %p46_p2  ;;  %s36_s30 = ssub.s32 %s2137_s16, %s2563_s28 }
  0x30   : > { %p2268_p11 = por %p2550_p8, %p46_p2  ;;  %p1901_p12 = scmp.lt.s32.totalorder %s2141_s17, 4 }
  0x31   : > { %p37_p10 = scmp.eq.s32.totalorder %s36_s30, 0  ;;  %s177_s26 = sand.u32 1, %s2129_s14  }
  0x32   : > { %s1370_s4 = sshll.u32 %s177_s26, 8  ;;  %s1487_s6 = sshll.u32 %s2137_s16, 12 }
  0x33   : > { %s2277_s5 = scalar_select %p37_p10, %s2129_s14, %s39_s25  }
  0x34   : > { %s2283_s9 = scalar_lea.hbm %s2535_s0, %s1487_s6  ;;  %s181_s21 = scalar_lea.vmem [#allocation2], %s1370_s4 }
  0x35   : > { %s188_s18 = sshll.u32 %s181_s21, 4  ;;  %p2289_p13 = pnand %p1901_p12, %p2262_p6  ;;  %s2285_s18 = int_to_ptr.vmem [resolvable:$true] %s188_s18 }
  0x36   : > { %s2293_s25 = scalar_lea.sflag [#allocation3], %s177_s26  ;;  %s2025_s30 = scalar_lea.hbm %s2283_s9, 4096 }
  0x37   : > { %p2026_p0 = scmp.ne.s32.totalorder %s2283_s9, %s2025_s30  ;;  %p2027_p3 = pneg %p2289_p13 }
  0x38   : > { %s2030_s29 = scalar_lea.hbm %s2535_s0, 16384  ;;  %p2031_p9 = scmp.lt.u32.totalorder %s2283_s9, %s2535_s0 }
  0x39   : > { %p2028_p5 = pnand %p2027_p3, %p2026_p0  ;;  %p2032_p1 = scmp.lt.u32.totalorder %s2030_s29, %s2025_s30 }
  0x3a   : > { %p2034_p4 = scmp.lt.u32.totalorder %s2025_s30, %s2283_s9 }
  0x3b   : > { %p2029_p7 = pneg %p2028_p5  ;;  %p2033_p2 = por %p2032_p1, %p2031_p9 }
  0x3d   : > { %p2035_p6 = por %p2034_p4, %p2033_p2 }
  0x3f   : > { %p2036_p8 = pnand %p2035_p6, %p2029_p7 }
  0x41   : > { %2039 = shalt.err (!%p2036_p8)
}
  0x42   : > { %s2040_s26 = scalar_lea.vmem %s2285_s18, 4096  ;;  %s2146_s21 = smov [#allocation2]  }
  0x43   : > { %p2041_p12 = scmp.ne.s32.totalorder %s2285_s18, %s2040_s26  ;;  %s2045_s4 = sshll.u32 %s2146_s21, 4  ;;  %s2046_s4 = int_to_ptr.vmem [resolvable:$false] %s2045_s4 }
  0x44   : > { %s2047_s6 = scalar_lea.vmem %s2046_s4, 8192  ;;  %p2048_p5 = scmp.lt.s32.totalorder %s2285_s18, %s2046_s4 }
  0x45   : > { %p2043_p10 = pnand %p2041_p12, %p2027_p3  ;;  %p2049_p9 = scmp.lt.s32.totalorder %s2047_s6, %s2040_s26 }
  0x47   : > { %p2044_p0 = pneg %p2043_p10  ;;  %p2050_p1 = por %p2049_p9, %p2048_p5 }
  0x49   : > { %p2051_p2 = pnand %p2050_p1, %p2044_p0 }
  0x4b   : > { %2054 = shalt.err (!%p2051_p2)
}
  0x4c   : > { %1895 = dma.hbm_to_vmem [thread:$0]  (!%p2289_p13), %s2283_s9, 4096, %s2285_s18, %s2293_s25, %s2144_s10, %s2144_s10, %s2145_s11  }
  0x4d   : > { %p2553_p3 = scmp.ne.s32.totalorder %s2547_s24, 0 }
  0x4e   : > { %s2327_s30 = sand.u32 (!%p2553_p3), 1, %s2125_s13   ;;  %p2554_p7 = scmp.ne.s32.totalorder (!%p2553_p3), %s2545_s22, 0 }
  0x4f   : > { %200 = sbr.rel (%p2553_p3) target bundleno = 415 (0x19f), region = 32  ;;  %s1374_s29 = sshll.u32 (!%p2553_p3), %s2327_s30, 8 }
  0x50   : > { %s203_s7 = scalar_lea.sflag (!%p2553_p3), [#allocation3], %s2327_s30  ;;  %s2333_s19 = scalar_lea.vmem (!%p2553_p3), [#allocation2], %s1374_s29 }
  0x56   : > { %2108 = dma.done.wait (%p2554_p7), %s203_s7, 4096  }
  0x57   : > { %2110 = vsyncadd (%p2554_p7), %s203_s7, 4294963200  ;;  %p2555_p13 = scmp.ne.s32.totalorder %s2543_s20, 0 }
  0x59   : > { %2112 = dma.done.wait (%p2555_p13), [#allocation6], 1024  }
  0x5a   : > { %2114 = vsyncadd (%p2555_p13), [#allocation6], 4294966272  ;;  %v1957_v0 = vld [vmem:[#allocation5] sm:$0xff]   ;;  %v1958_v1 = vld [vmem:[#allocation5 + $0x8] sm:$0xff]   ;;  %s2390_s24 = scalar_lea.vmem [#allocation7], %s1374_s29  ;;  %s1552_s10 = sshll.u32 %s2133_s15, 12 }
  0x5b   : > { %1784 = vmatprep.subr.bf16.mxu0 %v1957_v0  ;;  %1864 = vmatprep.subr.bf16.mxu1 %v1957_v0  ;;  %v1959_v2 = vld [vmem:[#allocation5 + $0x10] sm:$0xff]   ;;  %v1960_v3 = vld [vmem:[#allocation5 + $0x18] sm:$0xff]   ;;  %v1965_v4 = vld [vmem:[%s2333_s19] sm:$0xff]   ;;  %s1257_s11 = sshll.u32 %s2390_s24, 4  ;;  %s2481_s15 = scalar_lea.hbm %s2538_s3, %s1552_s10  ;;  %s2483_s11 = int_to_ptr.vmem [resolvable:$true] %s1257_s11 }
  0x5c   : > { %1785 = vmatpush3.bf16.msra.mxu0 %v1957_v0  ;;  %1872 = vmatpush3.bf16.msra.mxu1 %v1957_v0  ;;  %v1966_v5 = vld [vmem:[%s2333_s19 + $0x80] sm:$0xff]   ;;  %v1962_v7 = vld [vmem:[#allocation5 + $0x28] sm:$0xff]   ;;  %v1963_v8 = vld [vmem:[#allocation5 + $0x30] sm:$0xff]   ;;  %s1243_s25 = scalar_lea.sflag [#allocation4], %s2327_s30  ;;  %s2055_s8 = scalar_lea.vmem %s2483_s11, 4096 }
  0x5d   : > { %1786 = vmatprep.subr.bf16.mxu0 %v1958_v1  ;;  %1865 = vmatprep.subr.bf16.mxu1 %v1958_v1  ;;  %v1961_v6 = vld [vmem:[#allocation5 + $0x20] sm:$0xff]   ;;  %v1964_v9 = vld [vmem:[#allocation5 + $0x38] sm:$0xff]   ;;  %v1967_v10 = vld [vmem:[%s2333_s19 + $0x8] sm:$0xff]   ;;  %p2056_p4 = scmp.ne.s32.totalorder %s2483_s11, %s2055_s8  ;;  %s2147_s26 = smov [#allocation7]  }
  0x5e   : > { %1800 = vmatprep.mubr.bf16.mxu0 %v1965_v4  ;;  %1832 = vmatprep.mubr.bf16.mxu1 %v1966_v5  ;;  %v1968_v11 = vld [vmem:[%s2333_s19 + $0x88] sm:$0xff]   ;;  %v1969_v12 = vld [vmem:[%s2333_s19 + $0x10] sm:$0xff]   ;;  %v1971_v14 = vld [vmem:[%s2333_s19 + $0x18] sm:$0xff]   ;;  %s2059_s21 = sshll.u32 %s2147_s26, 4  ;;  %s2060_s21 = int_to_ptr.vmem [resolvable:$false] %s2059_s21 }
  0x5f   : > { %v1970_v13 = vld [vmem:[%s2333_s19 + $0x90] sm:$0xff]   ;;  %v1972_v15 = vld [vmem:[%s2333_s19 + $0x98] sm:$0xff]   ;;  %v1973_v16 = vld [vmem:[%s2333_s19 + $0x20] sm:$0xff]   ;;  %p2057_p6 = pnand %p2056_p4, %p2268_p11  ;;  %s2061_s4 = scalar_lea.vmem %s2060_s21, 8192 }
  0x60   : > { %1787 = vmatpush3.bf16.msra.mxu0 %v1958_v1  ;;  %1873 = vmatpush3.bf16.msra.mxu1 %v1958_v1  ;;  %v1974_v17 = vld [vmem:[%s2333_s19 + $0xa0] sm:$0xff]   ;;  %v1975_v18 = vld [vmem:[%s2333_s19 + $0x28] sm:$0xff]   ;;  %v1977_v20 = vld [vmem:[%s2333_s19 + $0x30] sm:$0xff]   ;;  %p2062_p12 = scmp.lt.s32.totalorder %s2483_s11, %s2060_s21  ;;  %p2063_p10 = scmp.lt.s32.totalorder %s2061_s4, %s2055_s8 }
  0x61   : > { %1788 = vmatprep.subr.bf16.mxu0 %v1959_v2  ;;  %1866 = vmatprep.subr.bf16.mxu1 %v1959_v2  ;;  %v1976_v19 = vld [vmem:[%s2333_s19 + $0xa8] sm:$0xff]   ;;  %v1978_v21 = vld [vmem:[%s2333_s19 + $0xb0] sm:$0xff]   ;;  %v1979_v22 = vld [vmem:[%s2333_s19 + $0x38] sm:$0xff]   ;;  %p2058_p8 = pneg %p2057_p6 }
  0x62   : > { %v1980_v23 = vld [vmem:[%s2333_s19 + $0xb8] sm:$0xff]   ;;  %v1981_v24 = vld [vmem:[%s2333_s19 + $0x40] sm:$0xff]   ;;  %v1983_v26 = vld [vmem:[%s2333_s19 + $0x48] sm:$0xff]   ;;  %p2064_p0 = por %p2063_p10, %p2062_p12 }
  0x63   : > { %v1982_v25 = vld [vmem:[%s2333_s19 + $0xc0] sm:$0xff]   ;;  %v1984_v27 = vld [vmem:[%s2333_s19 + $0xc8] sm:$0xff]   ;;  %v1985_v28 = vld [vmem:[%s2333_s19 + $0x50] sm:$0xff]  }
  0x64   : > { %1789 = vmatpush3.bf16.msra.mxu0 %v1959_v2  ;;  %1874 = vmatpush3.bf16.msra.mxu1 %v1959_v2  ;;  %v1986_v29 = vld [vmem:[%s2333_s19 + $0xd0] sm:$0xff]   ;;  %v1987_v30 = vld [vmem:[%s2333_s19 + $0x58] sm:$0xff]   ;;  %v1989_v32 = vld [vmem:[%s2333_s19 + $0x60] sm:$0xff]   ;;  %p2065_p5 = pnand %p2064_p0, %p2058_p8 }
  0x65   : > { %1790 = vmatprep.subr.bf16.mxu0 %v1960_v3  ;;  %1867 = vmatprep.subr.bf16.mxu1 %v1960_v3  ;;  %v1988_v31 = vld [vmem:[%s2333_s19 + $0xd8] sm:$0xff]   ;;  %v1990_v33 = vld [vmem:[%s2333_s19 + $0xe0] sm:$0xff]   ;;  %v1991_v34 = vld [vmem:[%s2333_s19 + $0x68] sm:$0xff]  }
  0x66   : > { %v1992_v35 = vld [vmem:[%s2333_s19 + $0xe8] sm:$0xff]   ;;  %v1993_v36 = vld [vmem:[%s2333_s19 + $0x70] sm:$0xff]   ;;  %v1995_v38 = vld [vmem:[%s2333_s19 + $0x78] sm:$0xff]  }
  0x67   : > { %v1994_v37 = vld [vmem:[%s2333_s19 + $0xf0] sm:$0xff]   ;;  %v1996_v39 = vld [vmem:[%s2333_s19 + $0xf8] sm:$0xff]   ;;  %v2378_v40 = vld [vmem:[%s2537_s2] ss:$0 sm:$0xff] }
  0x68   : > { %1791 = vmatpush3.bf16.msra.mxu0 %v1960_v3  ;;  %1875 = vmatpush3.bf16.msra.mxu1 %v1960_v3 }
  0x69   : > { %1792 = vmatprep.subr.bf16.mxu0 %v1961_v6  ;;  %1868 = vmatprep.subr.bf16.mxu1 %v1961_v6 }
  0x6c   : > { %1793 = vmatpush3.bf16.msra.mxu0 %v1961_v6  ;;  %1876 = vmatpush3.bf16.msra.mxu1 %v1961_v6 }
  0x6d   : > { %1794 = vmatprep.subr.bf16.mxu0 %v1962_v7  ;;  %1869 = vmatprep.subr.bf16.mxu1 %v1962_v7 }
  0x70   : > { %1795 = vmatpush3.bf16.msra.mxu0 %v1962_v7  ;;  %1877 = vmatpush3.bf16.msra.mxu1 %v1962_v7 }
  0x71   : > { %1796 = vmatprep.subr.bf16.mxu0 %v1963_v8  ;;  %1870 = vmatprep.subr.bf16.mxu1 %v1963_v8 }
  0x74   : > { %1797 = vmatpush3.bf16.msra.mxu0 %v1963_v8  ;;  %1878 = vmatpush3.bf16.msra.mxu1 %v1963_v8 }
  0x75   : > { %1798 = vmatprep.subr.bf16.mxu0 %v1964_v9  ;;  %1871 = vmatprep.subr.bf16.mxu1 %v1964_v9 }
  0x78   : > { %1799 = vmatpush3.bf16.msra.mxu0 %v1964_v9  ;;  %1879 = vmatpush3.bf16.msra.mxu1 %v1964_v9 }
  0x7b   : > { %1801 = vmatmul.mubr.bf16.vlgmr.msra.gmra.mrb[0].mxu0 %v1967_v10  ;;  %1833 = vmatmul.mubr.bf16.vlgmr.msra.gmra.mrb[0].mxu1 %v1968_v11 }
  0x7c   : > { %1804 = vmatprep.mubr.bf16.mxu0 %v1969_v12  ;;  %1836 = vmatprep.mubr.bf16.mxu1 %v1970_v13 }
  0x83   : > { %1805 = vmatmul.mubr.bf16.gmra.mrb[4].mxu0 %v1971_v14  ;;  %1837 = vmatmul.mubr.bf16.gmra.mrb[4].mxu1 %v1972_v15 }
  0x84   : > { %1808 = vmatprep.mubr.bf16.mxu0 %v1973_v16  ;;  %1840 = vmatprep.mubr.bf16.mxu1 %v1974_v17 }
  0x8b   : > { %1809 = vmatmul.mubr.bf16.gmra.mrb[8].mxu0 %v1975_v18  ;;  %1841 = vmatmul.mubr.bf16.gmra.mrb[8].mxu1 %v1976_v19 }
  0x8c   : > { %1812 = vmatprep.mubr.bf16.mxu0 %v1977_v20  ;;  %1844 = vmatprep.mubr.bf16.mxu1 %v1978_v21 }
  0x93   : > { %1813 = vmatmul.mubr.bf16.gmra.mrb[12].mxu0 %v1979_v22  ;;  %1845 = vmatmul.mubr.bf16.gmra.mrb[12].mxu1 %v1980_v23 }
  0x94   : > { %1816 = vmatprep.mubr.bf16.mxu0 %v1981_v24  ;;  %1848 = vmatprep.mubr.bf16.mxu1 %v1982_v25 }
  0x9b   : > { %1817 = vmatmul.mubr.bf16.gmra.mrb[16].mxu0 %v1983_v26  ;;  %1849 = vmatmul.mubr.bf16.gmra.mrb[16].mxu1 %v1984_v27 }
  0x9c   : > { %1820 = vmatprep.mubr.bf16.mxu0 %v1985_v28  ;;  %1852 = vmatprep.mubr.bf16.mxu1 %v1986_v29 }
  0xa3   : > { %1821 = vmatmul.mubr.bf16.gmra.mrb[20].mxu0 %v1987_v30  ;;  %1853 = vmatmul.mubr.bf16.gmra.mrb[20].mxu1 %v1988_v31 }
  0xa4   : > { %1824 = vmatprep.mubr.bf16.mxu0 %v1989_v32  ;;  %1856 = vmatprep.mubr.bf16.mxu1 %v1990_v33 }
  0xab   : > { %1825 = vmatmul.mubr.bf16.gmra.mrb[24].mxu0 %v1991_v34  ;;  %1857 = vmatmul.mubr.bf16.gmra.mrb[24].mxu1 %v1992_v35 }
  0xac   : > { %1828 = vmatprep.mubr.bf16.mxu0 %v1993_v36  ;;  %1860 = vmatprep.mubr.bf16.mxu1 %v1994_v37 }
  0xb3   : > { %1829 = vmatmul.mubr.bf16.gmra.mrb[28].mxu0 %v1995_v38  ;;  %1861 = vmatmul.mubr.bf16.gmra.mrb[28].mxu1 %v1996_v39 }
 0x14e   : > { %v1802_v41 = vpop.f32.mrb[0].mxu0  ;;  %v1834_v42 = vpop.f32.mrb[0].mxu1 }
 0x14f   : > { %v612_v43 = vadd.f32 %v1802_v41, %v2378_v40  ;;  %v740_v44 = vadd.f32 %v1834_v42, %v2378_v40  ;;  %v603_v45 = vpop.f32.mrb[1].mxu0  ;;  %v731_v46 = vpop.f32.mrb[1].mxu1 }
 0x150   : > { %v604_v47 = vadd.f32 %v2378_v40, %v603_v45  ;;  %v732_v48 = vadd.f32 %v2378_v40, %v731_v46  ;;  %v1803_v49 = vpop.f32.mrb[2].mxu0  ;;  %v1835_v50 = vpop.f32.mrb[2].mxu1 }
 0x151   : > { %v615_v51 = vadd.f32 %v1803_v49, %v2378_v40  ;;  %v743_v52 = vadd.f32 %v1835_v50, %v2378_v40  ;;  %v606_v53 = vpop.f32.mrb[3].mxu0  ;;  %v734_v54 = vpop.f32.mrb[3].mxu1  ;;  %v860_v57 = vmax.f32 %v612_v43, 0.0  ;;  %v892_v58 = vmax.f32 %v740_v44, 0.0 }
 0x152   : > { %v607_v55 = vadd.f32 %v2378_v40, %v606_v53  ;;  %v735_v56 = vadd.f32 %v2378_v40, %v734_v54  ;;  %v858_v61 = vmax.f32 %v604_v47, 0.0  ;;  %v890_v62 = vmax.f32 %v732_v48, 0.0 }
 0x153   : > { %v861_v59 = vmax.f32 %v615_v51, 0.0  ;;  %v893_v60 = vmax.f32 %v743_v52, 0.0 }
 0x154   : > { %v859_v63 = vmax.f32 %v607_v55, 0.0  ;;  %v891_v0 = vmax.f32 %v735_v56, 0.0 }
 0x155   : > { %v1561_v1 = vpack.c.bf16 %v861_v59, %v860_v57  ;;  %v1641_v2 = vpack.c.bf16 %v893_v60, %v892_v58 }
 0x156   : > { %v1556_v3 = vpack.c.bf16 %v859_v63, %v858_v61  ;;  %v1636_v4 = vpack.c.bf16 %v891_v0, %v890_v62  ;;  %v1806_v5 = vpop.f32.mrb[4].mxu0  ;;  %v1838_v6 = vpop.f32.mrb[4].mxu1 }
 0x157   : > { %1713 = vst [vmem:[%s2390_s24 + $0x8] sm:$0xff] %v1561_v1   ;;  %1729 = vst [vmem:[%s2390_s24 + $0x88] sm:$0xff] %v1641_v2   ;;  %v628_v7 = vadd.f32 %v1806_v5, %v2378_v40  ;;  %v756_v8 = vadd.f32 %v1838_v6, %v2378_v40  ;;  %v619_v9 = vpop.f32.mrb[5].mxu0  ;;  %v747_v10 = vpop.f32.mrb[5].mxu1 }
 0x158   : > { %1557 = vst [vmem:[%s2390_s24] sm:$0xff] %v1556_v3   ;;  %1728 = vst [vmem:[%s2390_s24 + $0x80] sm:$0xff] %v1636_v4   ;;  %v620_v11 = vadd.f32 %v2378_v40, %v619_v9  ;;  %v748_v12 = vadd.f32 %v2378_v40, %v747_v10  ;;  %v1807_v13 = vpop.f32.mrb[6].mxu0  ;;  %v1839_v14 = vpop.f32.mrb[6].mxu1 }
 0x159   : > { %v631_v15 = vadd.f32 %v1807_v13, %v2378_v40  ;;  %v759_v16 = vadd.f32 %v1839_v14, %v2378_v40  ;;  %v622_v17 = vpop.f32.mrb[7].mxu0  ;;  %v750_v18 = vpop.f32.mrb[7].mxu1  ;;  %v864_v21 = vmax.f32 %v628_v7, 0.0  ;;  %v896_v22 = vmax.f32 %v756_v8, 0.0 }
 0x15a   : > { %v623_v19 = vadd.f32 %v2378_v40, %v622_v17  ;;  %v751_v20 = vadd.f32 %v2378_v40, %v750_v18  ;;  %v862_v25 = vmax.f32 %v620_v11, 0.0  ;;  %v894_v26 = vmax.f32 %v748_v12, 0.0 }
 0x15b   : > { %v865_v23 = vmax.f32 %v631_v15, 0.0  ;;  %v897_v24 = vmax.f32 %v759_v16, 0.0 }
 0x15c   : > { %v863_v27 = vmax.f32 %v623_v19, 0.0  ;;  %v895_v28 = vmax.f32 %v751_v20, 0.0 }
 0x15d   : > { %v1571_v29 = vpack.c.bf16 %v865_v23, %v864_v21  ;;  %v1651_v30 = vpack.c.bf16 %v897_v24, %v896_v22 }
 0x15e   : > { %v1566_v31 = vpack.c.bf16 %v863_v27, %v862_v25  ;;  %v1646_v32 = vpack.c.bf16 %v895_v28, %v894_v26  ;;  %v1810_v33 = vpop.f32.mrb[8].mxu0  ;;  %v1842_v34 = vpop.f32.mrb[8].mxu1 }
 0x15f   : > { %1715 = vst [vmem:[%s2390_s24 + $0x18] sm:$0xff] %v1571_v29   ;;  %1731 = vst [vmem:[%s2390_s24 + $0x98] sm:$0xff] %v1651_v30   ;;  %v644_v35 = vadd.f32 %v1810_v33, %v2378_v40  ;;  %v772_v36 = vadd.f32 %v1842_v34, %v2378_v40  ;;  %v635_v37 = vpop.f32.mrb[9].mxu0  ;;  %v763_v38 = vpop.f32.mrb[9].mxu1 }
 0x160   : > { %1714 = vst [vmem:[%s2390_s24 + $0x10] sm:$0xff] %v1566_v31   ;;  %1730 = vst [vmem:[%s2390_s24 + $0x90] sm:$0xff] %v1646_v32   ;;  %v636_v39 = vadd.f32 %v2378_v40, %v635_v37  ;;  %v764_v41 = vadd.f32 %v2378_v40, %v763_v38  ;;  %v1811_v42 = vpop.f32.mrb[10].mxu0  ;;  %v1843_v43 = vpop.f32.mrb[10].mxu1 }
 0x161   : > { %v647_v44 = vadd.f32 %v1811_v42, %v2378_v40  ;;  %v775_v45 = vadd.f32 %v1843_v43, %v2378_v40  ;;  %v638_v46 = vpop.f32.mrb[11].mxu0  ;;  %v766_v47 = vpop.f32.mrb[11].mxu1  ;;  %v868_v50 = vmax.f32 %v644_v35, 0.0  ;;  %v900_v51 = vmax.f32 %v772_v36, 0.0 }
 0x162   : > { %v639_v48 = vadd.f32 %v2378_v40, %v638_v46  ;;  %v767_v49 = vadd.f32 %v2378_v40, %v766_v47  ;;  %v866_v54 = vmax.f32 %v636_v39, 0.0  ;;  %v898_v55 = vmax.f32 %v764_v41, 0.0 }
 0x163   : > { %v869_v52 = vmax.f32 %v647_v44, 0.0  ;;  %v901_v53 = vmax.f32 %v775_v45, 0.0 }
 0x164   : > { %v867_v56 = vmax.f32 %v639_v48, 0.0  ;;  %v899_v57 = vmax.f32 %v767_v49, 0.0 }
 0x165   : > { %v1581_v58 = vpack.c.bf16 %v869_v52, %v868_v50  ;;  %v1661_v59 = vpack.c.bf16 %v901_v53, %v900_v51 }
 0x166   : > { %v1576_v60 = vpack.c.bf16 %v867_v56, %v866_v54  ;;  %v1656_v61 = vpack.c.bf16 %v899_v57, %v898_v55  ;;  %v1814_v62 = vpop.f32.mrb[12].mxu0  ;;  %v1846_v63 = vpop.f32.mrb[12].mxu1 }
 0x167   : > { %1717 = vst [vmem:[%s2390_s24 + $0x28] sm:$0xff] %v1581_v58   ;;  %1733 = vst [vmem:[%s2390_s24 + $0xa8] sm:$0xff] %v1661_v59   ;;  %v660_v0 = vadd.f32 %v1814_v62, %v2378_v40  ;;  %v788_v1 = vadd.f32 %v1846_v63, %v2378_v40  ;;  %v651_v2 = vpop.f32.mrb[13].mxu0  ;;  %v779_v3 = vpop.f32.mrb[13].mxu1 }
 0x168   : > { %1716 = vst [vmem:[%s2390_s24 + $0x20] sm:$0xff] %v1576_v60   ;;  %1732 = vst [vmem:[%s2390_s24 + $0xa0] sm:$0xff] %v1656_v61   ;;  %v652_v4 = vadd.f32 %v2378_v40, %v651_v2  ;;  %v780_v5 = vadd.f32 %v2378_v40, %v779_v3  ;;  %v1815_v6 = vpop.f32.mrb[14].mxu0  ;;  %v1847_v7 = vpop.f32.mrb[14].mxu1 }
 0x169   : > { %v663_v8 = vadd.f32 %v1815_v6, %v2378_v40  ;;  %v791_v9 = vadd.f32 %v1847_v7, %v2378_v40  ;;  %v654_v10 = vpop.f32.mrb[15].mxu0  ;;  %v782_v11 = vpop.f32.mrb[15].mxu1  ;;  %v872_v14 = vmax.f32 %v660_v0, 0.0  ;;  %v904_v15 = vmax.f32 %v788_v1, 0.0 }
 0x16a   : > { %v655_v12 = vadd.f32 %v2378_v40, %v654_v10  ;;  %v783_v13 = vadd.f32 %v2378_v40, %v782_v11  ;;  %v870_v18 = vmax.f32 %v652_v4, 0.0  ;;  %v902_v19 = vmax.f32 %v780_v5, 0.0 }
 0x16b   : > { %v873_v16 = vmax.f32 %v663_v8, 0.0  ;;  %v905_v17 = vmax.f32 %v791_v9, 0.0 }
 0x16c   : > { %v871_v20 = vmax.f32 %v655_v12, 0.0  ;;  %v903_v21 = vmax.f32 %v783_v13, 0.0 }
 0x16d   : > { %v1591_v22 = vpack.c.bf16 %v873_v16, %v872_v14  ;;  %v1671_v23 = vpack.c.bf16 %v905_v17, %v904_v15 }
 0x16e   : > { %v1586_v24 = vpack.c.bf16 %v871_v20, %v870_v18  ;;  %v1666_v25 = vpack.c.bf16 %v903_v21, %v902_v19  ;;  %v1818_v26 = vpop.f32.mrb[16].mxu0  ;;  %v1850_v27 = vpop.f32.mrb[16].mxu1 }
 0x16f   : > { %1719 = vst [vmem:[%s2390_s24 + $0x38] sm:$0xff] %v1591_v22   ;;  %1735 = vst [vmem:[%s2390_s24 + $0xb8] sm:$0xff] %v1671_v23   ;;  %v676_v28 = vadd.f32 %v1818_v26, %v2378_v40  ;;  %v804_v29 = vadd.f32 %v1850_v27, %v2378_v40  ;;  %v667_v30 = vpop.f32.mrb[17].mxu0  ;;  %v795_v31 = vpop.f32.mrb[17].mxu1 }
 0x170   : > { %1718 = vst [vmem:[%s2390_s24 + $0x30] sm:$0xff] %v1586_v24   ;;  %1734 = vst [vmem:[%s2390_s24 + $0xb0] sm:$0xff] %v1666_v25   ;;  %v668_v32 = vadd.f32 %v2378_v40, %v667_v30  ;;  %v796_v33 = vadd.f32 %v2378_v40, %v795_v31  ;;  %v1819_v34 = vpop.f32.mrb[18].mxu0  ;;  %v1851_v35 = vpop.f32.mrb[18].mxu1 }
 0x171   : > { %v679_v36 = vadd.f32 %v1819_v34, %v2378_v40  ;;  %v807_v37 = vadd.f32 %v1851_v35, %v2378_v40  ;;  %v670_v38 = vpop.f32.mrb[19].mxu0  ;;  %v798_v39 = vpop.f32.mrb[19].mxu1  ;;  %v876_v43 = vmax.f32 %v676_v28, 0.0  ;;  %v908_v44 = vmax.f32 %v804_v29, 0.0 }
 0x172   : > { %v671_v41 = vadd.f32 %v2378_v40, %v670_v38  ;;  %v799_v42 = vadd.f32 %v2378_v40, %v798_v39  ;;  %v874_v47 = vmax.f32 %v668_v32, 0.0  ;;  %v906_v48 = vmax.f32 %v796_v33, 0.0 }
 0x173   : > { %v877_v45 = vmax.f32 %v679_v36, 0.0  ;;  %v909_v46 = vmax.f32 %v807_v37, 0.0 }
 0x174   : > { %v875_v49 = vmax.f32 %v671_v41, 0.0  ;;  %v907_v50 = vmax.f32 %v799_v42, 0.0 }
 0x175   : > { %v1601_v51 = vpack.c.bf16 %v877_v45, %v876_v43  ;;  %v1681_v52 = vpack.c.bf16 %v909_v46, %v908_v44 }
 0x176   : > { %v1596_v53 = vpack.c.bf16 %v875_v49, %v874_v47  ;;  %v1676_v54 = vpack.c.bf16 %v907_v50, %v906_v48  ;;  %v1822_v55 = vpop.f32.mrb[20].mxu0  ;;  %v1854_v56 = vpop.f32.mrb[20].mxu1 }
 0x177   : > { %1721 = vst [vmem:[%s2390_s24 + $0x48] sm:$0xff] %v1601_v51   ;;  %1737 = vst [vmem:[%s2390_s24 + $0xc8] sm:$0xff] %v1681_v52   ;;  %v692_v57 = vadd.f32 %v1822_v55, %v2378_v40  ;;  %v820_v58 = vadd.f32 %v1854_v56, %v2378_v40  ;;  %v683_v59 = vpop.f32.mrb[21].mxu0  ;;  %v811_v60 = vpop.f32.mrb[21].mxu1 }
 0x178   : > { %1720 = vst [vmem:[%s2390_s24 + $0x40] sm:$0xff] %v1596_v53   ;;  %1736 = vst [vmem:[%s2390_s24 + $0xc0] sm:$0xff] %v1676_v54   ;;  %v684_v61 = vadd.f32 %v2378_v40, %v683_v59  ;;  %v812_v62 = vadd.f32 %v2378_v40, %v811_v60  ;;  %v1823_v63 = vpop.f32.mrb[22].mxu0  ;;  %v1855_v0 = vpop.f32.mrb[22].mxu1 }
 0x179   : > { %v695_v1 = vadd.f32 %v1823_v63, %v2378_v40  ;;  %v823_v2 = vadd.f32 %v1855_v0, %v2378_v40  ;;  %v686_v3 = vpop.f32.mrb[23].mxu0  ;;  %v814_v4 = vpop.f32.mrb[23].mxu1  ;;  %v880_v7 = vmax.f32 %v692_v57, 0.0  ;;  %v912_v8 = vmax.f32 %v820_v58, 0.0 }
 0x17a   : > { %v687_v5 = vadd.f32 %v2378_v40, %v686_v3  ;;  %v815_v6 = vadd.f32 %v2378_v40, %v814_v4  ;;  %v878_v11 = vmax.f32 %v684_v61, 0.0  ;;  %v910_v12 = vmax.f32 %v812_v62, 0.0 }
 0x17b   : > { %v881_v9 = vmax.f32 %v695_v1, 0.0  ;;  %v913_v10 = vmax.f32 %v823_v2, 0.0 }
 0x17c   : > { %v879_v13 = vmax.f32 %v687_v5, 0.0  ;;  %v911_v14 = vmax.f32 %v815_v6, 0.0 }
 0x17d   : > { %v1611_v15 = vpack.c.bf16 %v881_v9, %v880_v7  ;;  %v1691_v16 = vpack.c.bf16 %v913_v10, %v912_v8 }
 0x17e   : > { %v1606_v17 = vpack.c.bf16 %v879_v13, %v878_v11  ;;  %v1686_v18 = vpack.c.bf16 %v911_v14, %v910_v12  ;;  %v1826_v19 = vpop.f32.mrb[24].mxu0  ;;  %v1858_v20 = vpop.f32.mrb[24].mxu1 }
 0x17f   : > { %1723 = vst [vmem:[%s2390_s24 + $0x58] sm:$0xff] %v1611_v15   ;;  %1739 = vst [vmem:[%s2390_s24 + $0xd8] sm:$0xff] %v1691_v16   ;;  %v708_v21 = vadd.f32 %v1826_v19, %v2378_v40  ;;  %v836_v22 = vadd.f32 %v1858_v20, %v2378_v40  ;;  %v699_v23 = vpop.f32.mrb[25].mxu0  ;;  %v827_v24 = vpop.f32.mrb[25].mxu1 }
 0x180   : > { %1722 = vst [vmem:[%s2390_s24 + $0x50] sm:$0xff] %v1606_v17   ;;  %1738 = vst [vmem:[%s2390_s24 + $0xd0] sm:$0xff] %v1686_v18   ;;  %v700_v25 = vadd.f32 %v2378_v40, %v699_v23  ;;  %v828_v26 = vadd.f32 %v2378_v40, %v827_v24  ;;  %v1827_v27 = vpop.f32.mrb[26].mxu0  ;;  %v1859_v28 = vpop.f32.mrb[26].mxu1 }
 0x181   : > { %v711_v29 = vadd.f32 %v1827_v27, %v2378_v40  ;;  %v839_v30 = vadd.f32 %v1859_v28, %v2378_v40  ;;  %v702_v31 = vpop.f32.mrb[27].mxu0  ;;  %v830_v32 = vpop.f32.mrb[27].mxu1  ;;  %v884_v35 = vmax.f32 %v708_v21, 0.0  ;;  %v916_v36 = vmax.f32 %v836_v22, 0.0 }
 0x182   : > { %v703_v33 = vadd.f32 %v2378_v40, %v702_v31  ;;  %v831_v34 = vadd.f32 %v2378_v40, %v830_v32  ;;  %v882_v39 = vmax.f32 %v700_v25, 0.0  ;;  %v914_v41 = vmax.f32 %v828_v26, 0.0 }
 0x183   : > { %v885_v37 = vmax.f32 %v711_v29, 0.0  ;;  %v917_v38 = vmax.f32 %v839_v30, 0.0 }
 0x184   : > { %v883_v42 = vmax.f32 %v703_v33, 0.0  ;;  %v915_v43 = vmax.f32 %v831_v34, 0.0 }
 0x185   : > { %v1621_v44 = vpack.c.bf16 %v885_v37, %v884_v35  ;;  %v1701_v45 = vpack.c.bf16 %v917_v38, %v916_v36 }
 0x186   : > { %v1616_v46 = vpack.c.bf16 %v883_v42, %v882_v39  ;;  %v1696_v47 = vpack.c.bf16 %v915_v43, %v914_v41  ;;  %v1830_v48 = vpop.f32.mrb[28].mxu0  ;;  %v1862_v49 = vpop.f32.mrb[28].mxu1 }
 0x187   : > { %1725 = vst [vmem:[%s2390_s24 + $0x68] sm:$0xff] %v1621_v44   ;;  %1741 = vst [vmem:[%s2390_s24 + $0xe8] sm:$0xff] %v1701_v45   ;;  %v724_v50 = vadd.f32 %v1830_v48, %v2378_v40  ;;  %v852_v51 = vadd.f32 %v1862_v49, %v2378_v40  ;;  %v715_v52 = vpop.f32.mrb[29].mxu0  ;;  %v843_v53 = vpop.f32.mrb[29].mxu1 }
 0x188   : > { %1724 = vst [vmem:[%s2390_s24 + $0x60] sm:$0xff] %v1616_v46   ;;  %1740 = vst [vmem:[%s2390_s24 + $0xe0] sm:$0xff] %v1696_v47   ;;  %v716_v54 = vadd.f32 %v2378_v40, %v715_v52  ;;  %v844_v55 = vadd.f32 %v2378_v40, %v843_v53  ;;  %v1831_v56 = vpop.f32.mrb[30].mxu0  ;;  %v1863_v57 = vpop.f32.mrb[30].mxu1 }
 0x189   : > { %v727_v58 = vadd.f32 %v1831_v56, %v2378_v40  ;;  %v855_v59 = vadd.f32 %v1863_v57, %v2378_v40  ;;  %v718_v60 = vpop.f32.mrb[31].mxu0  ;;  %v846_v61 = vpop.f32.mrb[31].mxu1  ;;  %v888_v0 = vmax.f32 %v724_v50, 0.0  ;;  %v920_v1 = vmax.f32 %v852_v51, 0.0 }
 0x18a   : > { %v719_v62 = vadd.f32 %v2378_v40, %v718_v60  ;;  %v847_v63 = vadd.f32 %v2378_v40, %v846_v61  ;;  %v886_v4 = vmax.f32 %v716_v54, 0.0  ;;  %v918_v5 = vmax.f32 %v844_v55, 0.0 }
 0x18b   : > { %v889_v2 = vmax.f32 %v727_v58, 0.0  ;;  %v921_v3 = vmax.f32 %v855_v59, 0.0 }
 0x18c   : > { %v887_v6 = vmax.f32 %v719_v62, 0.0  ;;  %v919_v7 = vmax.f32 %v847_v63, 0.0 }
 0x18d   : > { %v1631_v8 = vpack.c.bf16 %v889_v2, %v888_v0  ;;  %v1711_v9 = vpack.c.bf16 %v921_v3, %v920_v1 }
 0x18e   : > { %v1626_v40 = vpack.c.bf16 %v887_v6, %v886_v4  ;;  %v1706_v10 = vpack.c.bf16 %v919_v7, %v918_v5 }
 0x18f   : > { %1727 = vst [vmem:[%s2390_s24 + $0x78] sm:$0xff] %v1631_v8   ;;  %1743 = vst [vmem:[%s2390_s24 + $0xf8] sm:$0xff] %v1711_v9  }
 0x190   : > { %1726 = vst [vmem:[%s2390_s24 + $0x70] sm:$0xff] %v1626_v40   ;;  %1742 = vst [vmem:[%s2390_s24 + $0xf0] sm:$0xff] %v1706_v10  }
 0x191   : > { %2068 = shalt.err (!%p2065_p5)
}
 0x192   : > { %s2069_s6 = scalar_lea.hbm %s2481_s15, 4096  ;;  %s2073_s19 = scalar_lea.hbm %s2538_s3, 16384 }
 0x193   : > { %p2070_p9 = scmp.ne.s32.totalorder %s2481_s15, %s2069_s6  ;;  %p2074_p3 = scmp.lt.u32.totalorder %s2481_s15, %s2538_s3 }
 0x194   : > { %p2075_p7 = scmp.lt.u32.totalorder %s2073_s19, %s2069_s6  ;;  %p2077_p4 = scmp.lt.u32.totalorder %s2069_s6, %s2481_s15 }
 0x195   : > { %p2071_p1 = pnand %p2070_p9, %p2268_p11 }
 0x196   : > { %p2076_p13 = por %p2075_p7, %p2074_p3 }
 0x197   : > { %p2072_p2 = pneg %p2071_p1 }
 0x198   : > { %p2078_p6 = por %p2077_p4, %p2076_p13 }
 0x19a   : > { %p2079_p8 = pnand %p2078_p6, %p2072_p2 }
 0x19c   : > { %2082 = shalt.err (!%p2079_p8)
}
 0x19d   : > { %s2148_s24 = smov 64   ;;  %s2149_s10 = smov 4  }
 0x19e   : > { %1886 = dma.vmem_to_hbm [thread:$0]  (%p2268_p11), %s2483_s11, 4096, %s2481_s15, %s1243_s25, %s2148_s24, %s2148_s24, %s2149_s10  }
 0x19f PF: > { %p1903_p12 = scmp.ge.s32.totalorder %s2141_s17, 2  ;;  %s1272_s9 = sand.u32 1, %s2121_s12  }
 0x1a0   : > { %p2556_p10 = scmp.ne.s32.totalorder %s2546_s23, 0  ;;  %s1273_s18 = scalar_lea.sflag [#allocation4], %s1272_s9 }
 0x1a2   : > { %p1897_p0 = pnand %p1903_p12, %p2556_p10 }
 0x1a4   : > { %2116 = dma.done.wait (!%p1897_p0), %s1273_s18, 4096  }
 0x1a5   : > { %2118 = vsyncadd (!%p1897_p0), %s1273_s18, 4294963200  ;;  %s20_s17 = sadd.s32 1, %s2141_s17   ;;  %s2557_s12 = smov %s2125_s13 }
 0x1a6   : > { %p17_p5 = scmp.ge.s32.totalorder %s20_s17, 6   ;;  %s2558_s13 = smov %s2129_s14 }
 0x1a7   : > { %s2559_s14 = smov %s2277_s5  ;;  %s2560_s15 = smov %s2137_s16 }
 0x1a8   : > { %s2561_s16 = smov %s2563_s28  ;;  %19 = sbr.rel (!%p17_p5) target bundleno = 7 (0x7), region = 85 }
 0x1af   :  { %1278 = vsyncpa [#allocation3], 1 }
 0x1b0   :  { %1280 = vsyncpa [#allocation3 + $0x1], 1 }
 0x1b1   :  { %1281 = vsyncpa [#allocation6], 1 }
 0x1b2   :  { %1282 = vsyncpa [#allocation4], 1 }
 0x1b3   :  { %1284 = vsyncpa [#allocation4 + $0x1], 1 }

</bundles_post_ra>
